<compile_context>
chip_gen: v7x
topology: tpu7x:2x2x1
jax: 0.10.0
libtpu: 0.0.40
codegen_flags: <defaults>
</compile_context>

<pallas_src>
import functools

import jax
import jax.numpy as jnp
from jax.experimental import pallas as pl
from jax.experimental.pallas import tpu as pltpu

LANE = 128
SUBLANE = 8


def _round_up(x, m):
    return (x + m - 1) // m * m


def _choose_tile(n, hidden, itemsize, vmem_budget_bytes, max_tile_rows=None):
    """Pick the node-tile height: as large as the VMEM budget allows."""
    per_row = max(hidden, 1) * itemsize
    tile = vmem_budget_bytes // (2 * per_row)            # 2x: double-buffered
    tile = max(LANE, (tile // LANE) * LANE)              # lane-aligned (batch row)
    if max_tile_rows is not None:
        tile = max(LANE, min(tile, _round_up(max_tile_rows, LANE)))
    tile = min(tile, _round_up(n, LANE))                 # don't exceed the data
    tile = min(tile, 8 * 1024)                           # keep one-hot temporaries modest
    return tile


def _mlp_pool_kernel(batch_ref, h_ref, w_ref, out_ref, sums_ref, *,
                     valid_n, tile, num_tiles, tiles_per_split):
    # batch_ref: (1, TILE) int32   graph id per node (pad entries = g_pad -> no hit)
    # h_ref:     (TILE, H)         node-feature tile (caller's streaming dtype)
    # w_ref:     (H, 128) f32      Linear weight W^T, lane-padded 7 -> 128
    # out_ref:   (1, G_pad, 128)   this core's partial projection (resident over i)
    # sums_ref:  (G_pad, H) f32    per-core segment-sum accumulator (VMEM scratch)
    c = pl.program_id(0)                       # core-split index ("parallel")
    i = pl.program_id(1)                       # node-tile index   ("arbitrary")
    t = c * tiles_per_split + i                # global node-tile index (may overrun)

    @pl.when(i == 0)
    def _init():
        sums_ref[...] = jnp.zeros_like(sums_ref)

    g_pad = sums_ref.shape[0]
    batch = batch_ref[...]                                             # (1, TILE)
    graph_ids = jax.lax.broadcasted_iota(jnp.int32, (g_pad, tile), 0)  # (G_pad, TILE)
    hit = graph_ids == batch                                           # bool

    def accumulate(h_tile):
        onehot = hit.astype(h_tile.dtype)      # single cast; 0/1 exact in bf16
        sums_ref[...] += jnp.dot(onehot, h_tile,
                                 preferred_element_type=jnp.float32)

    if valid_n % tile != 0:
        # Only the (possibly clamped-duplicate) final node tile contains garbage
        # rows past N; zero them so 0 * NaN cannot poison the MXU accumulation.
        @pl.when(t < num_tiles - 1)
        def _interior():
            accumulate(h_ref[...])

        @pl.when(t >= num_tiles - 1)
        def _tail():
            row = jax.lax.broadcasted_iota(jnp.int32, (tile, 1), 0)
            row_valid = (num_tiles - 1) * tile + row < valid_n
            accumulate(jnp.where(row_valid, h_ref[...], 0))
    else:
        accumulate(h_ref[...])

    @pl.when(i == pl.num_programs(1) - 1)
    def _finish():
        # Deferred mean: (sums / counts) @ W^T == (sums @ W^T) / counts,
        # so only project here; divide + bias + cross-core combine are a tiny
        # (G,7) op in the wrapper.
        proj = jnp.dot(sums_ref[...], w_ref[...],
                       preferred_element_type=jnp.float32)             # (G_pad, 128)
        out_ref[...] = proj[None]


def mlp_forward(h, batch, weight, bias, num_graphs, *,
                compute_dtype=None,
                num_core_splits=2,
                vmem_budget_bytes=16 * 1024 * 1024,
                max_tile_rows=None):
    """h: (N, H), batch: (N,) int graph ids in [0, G), weight: (7, H), bias: (7,).

    h is streamed in its own dtype; pass bf16 h to halve HBM traffic (the cast
    is deliberately NOT done here, since that would re-read/write all of h).
    """
    n, hidden = h.shape
    out_dim = weight.shape[0]

    if compute_dtype is not None and h.dtype != compute_dtype:
        # NOTE: this costs one extra pass over h in HBM; prefer supplying h
        # already in the streaming dtype.
        h = h.astype(compute_dtype)
    itemsize = jnp.dtype(h.dtype).itemsize

    tile = _choose_tile(n, hidden, itemsize, vmem_budget_bytes, max_tile_rows)
    num_tiles = pl.cdiv(n, tile)
    num_splits = max(1, min(num_core_splits, num_tiles))
    tiles_per_split = pl.cdiv(num_tiles, num_splits)
    g_pad = _round_up(num_graphs, SUBLANE)

    # batch: cheap (4 B/node) pad to the full grid extent; padded ids (= g_pad)
    # match no graph row, so padded / duplicated tiles contribute nothing.
    total_nodes = num_splits * tiles_per_split * tile
    batch_p = jnp.full((1, total_nodes), g_pad, jnp.int32).at[0, :n].set(
        batch.astype(jnp.int32))

    # Lane-dense weight: (H, 128) with the real 7 outputs in the first lanes.
    w_p = jnp.zeros((hidden, LANE), jnp.float32).at[:, :out_dim].set(
        weight.T.astype(jnp.float32))

    # Index maps. The h block index is clamped so a possible overrun tile of
    # the second core re-reads the last real block (its one-hot is all-miss).
    def h_index(c, i):
        return (jnp.minimum(c * tiles_per_split + i, num_tiles - 1), 0)

    def batch_index(c, i):
        return (0, c * tiles_per_split + i)

    # VMEM limit derived from actual buffer sizes (+ headroom), capped for v7x.
    hid_lanes = _round_up(hidden, LANE)
    needed = (2 * tile * hid_lanes * itemsize            # h double-buffer
              + 2 * SUBLANE * tile * 4                   # batch double-buffer
              + 2 * _round_up(hidden, SUBLANE) * LANE * 4  # W^T
              + 2 * g_pad * LANE * 4                     # output block
              + g_pad * hid_lanes * 4)                   # sums scratch
    vmem_limit = int(min(max(needed * 3 // 2 + (4 << 20), 24 << 20), 60 << 20))

    kernel = functools.partial(_mlp_pool_kernel, valid_n=n, tile=tile,
                               num_tiles=num_tiles,
                               tiles_per_split=tiles_per_split)

    partial_proj = pl.pallas_call(
        kernel,
        out_shape=jax.ShapeDtypeStruct((num_splits, g_pad, LANE), jnp.float32),
        grid_spec=pltpu.PrefetchScalarGridSpec(
            num_scalar_prefetch=0,
            grid=(num_splits, tiles_per_split),
            in_specs=[
                pl.BlockSpec((1, tile), batch_index),         # batch tile
                pl.BlockSpec((tile, hidden), h_index),        # h tile (unpadded N)
                pl.BlockSpec((hidden, LANE), lambda c, i: (0, 0)),  # W^T
            ],
            out_specs=pl.BlockSpec((1, g_pad, LANE), lambda c, i: (c, 0, 0)),
            scratch_shapes=[pltpu.VMEM((g_pad, hidden), jnp.float32)],
        ),
        compiler_params=pltpu.CompilerParams(
            dimension_semantics=("parallel", "arbitrary"),
            vmem_limit_bytes=vmem_limit,
        ),
    )(batch_p, h, w_p)

    # Tiny (G, 7) combine: sum core partials, divide by counts, add bias.
    proj = partial_proj.sum(axis=0)[:num_graphs, :out_dim]            # (G, 7)
    counts = jnp.zeros((num_graphs,), jnp.float32).at[batch].add(1.0)
    inv = 1.0 / jnp.maximum(counts, 1.0)          # empty graph -> bias only
    return proj * inv[:, None] + bias.astype(jnp.float32)


if __name__ == "__main__":
    key = jax.random.PRNGKey(0)
    k_h, k_w, k_b, k_h2, k_b2 = jax.random.split(key, 5)

    HIDDEN, OUT = 32, 7
    bound = 1.0 / (HIDDEN ** 0.5)   # PyTorch Linear default init range
    weight = jax.random.uniform(k_w, (OUT, HIDDEN), jnp.float32, -bound, bound)
    bias = jax.random.uniform(k_b, (OUT,), jnp.float32, -bound, bound)

    def reference(h, batch, g):
        # Exact-f32 reference (scatter-add pooling + VPU-only projection).
        hf = h.astype(jnp.float32)
        sums = jnp.zeros((g, HIDDEN), jnp.float32).at[batch].add(hf)
        counts = jnp.zeros((g,), jnp.float32).at[batch].add(1.0)
        pooled = sums / jnp.maximum(counts, 1.0)[:, None]
        return (pooled[:, None, :] * weight[None, :, :]).sum(-1) + bias

    # --- Test 1: tiny, single tile, f32 -------------------------------------
    N, G = 8, 2
    h = jax.random.normal(k_h, (N, HIDDEN), jnp.float32)
    batch = jnp.array([0, 0, 0, 0, 1, 1, 1, 1], jnp.int32)
    out = jax.block_until_ready(mlp_forward(h, batch, weight, bias, G))
    ref = reference(h, batch, G)
    assert out.shape == (G, OUT)
    assert jnp.allclose(out, ref, atol=5e-3, rtol=5e-3), "f32 single-tile mismatch"

    # --- Test 2: ragged multi-tile + 2-way core split, f32 ------------------
    N2, G2 = 333, 5
    h2 = jax.random.normal(k_h2, (N2, HIDDEN), jnp.float32)
    batch2 = jnp.sort(jax.random.randint(k_b2, (N2,), 0, G2)).astype(jnp.int32)
    out2 = jax.block_until_ready(
        mlp_forward(h2, batch2, weight, bias, G2, max_tile_rows=128))
    ref2 = reference(h2, batch2, G2)
    assert jnp.allclose(out2, ref2, atol=5e-3, rtol=5e-3), "f32 multi-tile mismatch"

    # --- Test 3: bf16 streamed h (halved HBM traffic), loose tolerance ------
    out3 = jax.block_until_ready(
        mlp_forward(h2.astype(jnp.bfloat16), batch2, weight, bias, G2,
                    max_tile_rows=128))
    assert jnp.allclose(out3, ref2, atol=5e-2, rtol=5e-2), "bf16 mismatch"

    print("KERNEL_OK")
</pallas_src>

<mosaic_0001>
module attributes {stable_mosaic.version = 11 : i64} {
  func.func @_mlp_pool_kernel(%arg0: i32, %arg1: i32, %arg2: memref<1x128xi32, #tpu.memory_space<vmem>>, %arg3: memref<128x32xf32, #tpu.memory_space<vmem>>, %arg4: memref<32x128xf32, #tpu.memory_space<vmem>>, %arg5: memref<1x8x128xf32, #tpu.memory_space<vmem>>, %arg6: memref<8x32xf32, #tpu.memory_space<vmem>>) attributes {dimension_semantics = [#tpu.dimension_semantics<parallel>, #tpu.dimension_semantics<arbitrary>], iteration_bounds = array<i64: 1, 1>, scalar_prefetch = 0 : i64, scratch_operands = 1 : i64, tpu.core_type = #tpu.core_type<tc>, window_params = [{transform_indices = @transform_0, window_bounds = array<i64: 1, 128>}, {transform_indices = @transform_1, window_bounds = array<i64: 128, 32>}, {pipeline_mode = #tpu.pipeline_mode<synchronous>, transform_indices = @transform_2, window_bounds = array<i64: 32, 128>}, {transform_indices = @transform_3, window_bounds = array<i64: 1, 8, 128>}]} {
    %c1_i32 = arith.constant 1 : i32
    %0 = arith.muli %arg0, %c1_i32 : i32
    %1 = arith.addi %0, %arg1 : i32
    %c0_i32 = arith.constant 0 : i32
    %2 = arith.cmpi eq, %arg1, %c0_i32 : i32
    %3 = arith.extui %2 : i1 to i32
    %c0_i32_0 = arith.constant 0 : i32
    %4 = arith.cmpi ne, %3, %c0_i32_0 : i32
    scf.if %4 {
      %cst = arith.constant 0.000000e+00 : f32
      %18 = vector.broadcast %cst : f32 to vector<8x32xf32>
      %c0_8 = arith.constant 0 : index
      %c0_9 = arith.constant 0 : index
      %19 = vector.load %arg6[%c0_8, %c0_9] : memref<8x32xf32, #tpu.memory_space<vmem>>, vector<8x32xf32>
      tpu.vector_store %arg6[%c0_8, %c0_9], %18 {strides = array<i32>} : memref<8x32xf32, #tpu.memory_space<vmem>>, vector<8x32xf32>,
    } else {
    }
    %c0 = arith.constant 0 : index
    %c0_1 = arith.constant 0 : index
    %5 = vector.load %arg2[%c0, %c0_1] : memref<1x128xi32, #tpu.memory_space<vmem>>, vector<1x128xi32>
    %6 = tpu.iota {dimensions = array<i32: 0>} : vector<8x128xi32>
    %7 = vector.broadcast %5 : vector<1x128xi32> to vector<8x128xi32>
    %8 = arith.cmpi eq, %6, %7 : vector<8x128xi32>
    %c0_i32_2 = arith.constant 0 : i32
    %9 = arith.cmpi slt, %1, %c0_i32_2 : i32
    %10 = arith.extui %9 : i1 to i32
    %c0_i32_3 = arith.constant 0 : i32
    %11 = arith.cmpi ne, %10, %c0_i32_3 : i32
    scf.if %11 {
      %c0_8 = arith.constant 0 : index
      %c0_9 = arith.constant 0 : index
      %18 = vector.load %arg3[%c0_8, %c0_9] : memref<128x32xf32, #tpu.memory_space<vmem>>, vector<128x32xf32>
      %19 = arith.extui %8 : vector<8x128xi1> to vector<8x128xi32>
      %20 = arith.sitofp %19 : vector<8x128xi32> to vector<8x128xf32>
      %c0_10 = arith.constant 0 : index
      %c0_11 = arith.constant 0 : index
      %21 = vector.load %arg6[%c0_10, %c0_11] : memref<8x32xf32, #tpu.memory_space<vmem>>, vector<8x32xf32>
      %cst = arith.constant dense<0.000000e+00> : vector<8x32xf32>
      %22 = tpu.matmul %20, %18, %cst {dimension_numbers = #tpu.dot_dimension_numbers<[1], [0], [0], [1], [0, 0, 1, 1], [], []>} : vector<8x128xf32>, vector<128x32xf32>, vector<8x32xf32> -> vector<8x32xf32>
      %23 = arith.addf %21, %22 : vector<8x32xf32>
      %c0_12 = arith.constant 0 : index
      %c0_13 = arith.constant 0 : index
      %24 = vector.load %arg6[%c0_12, %c0_13] : memref<8x32xf32, #tpu.memory_space<vmem>>, vector<8x32xf32>
      tpu.vector_store %arg6[%c0_12, %c0_13], %23 {strides = array<i32>} : memref<8x32xf32, #tpu.memory_space<vmem>>, vector<8x32xf32>,
    } else {
    }
    %c0_i32_4 = arith.constant 0 : i32
    %12 = arith.cmpi sge, %1, %c0_i32_4 : i32
    %13 = arith.extui %12 : i1 to i32
    %c0_i32_5 = arith.constant 0 : i32
    %14 = arith.cmpi ne, %13, %c0_i32_5 : i32
    scf.if %14 {
      %18 = tpu.iota {dimensions = array<i32: 0>} : vector<128x1xi32>
      %c0_i32_8 = arith.constant 0 : i32
      %19 = vector.broadcast %c0_i32_8 : i32 to vector<128x1xi32>
      %20 = arith.addi %19, %18 : vector<128x1xi32>
      %c8_i32 = arith.constant 8 : i32
      %21 = vector.broadcast %c8_i32 : i32 to vector<128x1xi32>
      %22 = arith.cmpi slt, %20, %21 : vector<128x1xi32>
      %c0_9 = arith.constant 0 : index
      %c0_10 = arith.constant 0 : index
      %23 = vector.load %arg3[%c0_9, %c0_10] : memref<128x32xf32, #tpu.memory_space<vmem>>, vector<128x32xf32>
      %c0_i32_11 = arith.constant 0 : i32
      %24 = arith.sitofp %c0_i32_11 : i32 to f32
      %25 = vector.shape_cast %22 : vector<128x1xi1> to vector<128x1xi1>
      %26 = vector.broadcast %25 : vector<128x1xi1> to vector<128x32xi1>
      %27 = vector.broadcast %24 : f32 to vector<128x32xf32>
      %28 = arith.select %26, %23, %27 : vector<128x32xi1>, vector<128x32xf32>
      %29 = arith.extui %8 : vector<8x128xi1> to vector<8x128xi32>
      %30 = arith.sitofp %29 : vector<8x128xi32> to vector<8x128xf32>
      %c0_12 = arith.constant 0 : index
      %c0_13 = arith.constant 0 : index
      %31 = vector.load %arg6[%c0_12, %c0_13] : memref<8x32xf32, #tpu.memory_space<vmem>>, vector<8x32xf32>
      %cst = arith.constant dense<0.000000e+00> : vector<8x32xf32>
      %32 = tpu.matmul %30, %28, %cst {dimension_numbers = #tpu.dot_dimension_numbers<[1], [0], [0], [1], [0, 0, 1, 1], [], []>} : vector<8x128xf32>, vector<128x32xf32>, vector<8x32xf32> -> vector<8x32xf32>
      %33 = arith.addf %31, %32 : vector<8x32xf32>
      %c0_14 = arith.constant 0 : index
      %c0_15 = arith.constant 0 : index
      %34 = vector.load %arg6[%c0_14, %c0_15] : memref<8x32xf32, #tpu.memory_space<vmem>>, vector<8x32xf32>
      tpu.vector_store %arg6[%c0_14, %c0_15], %33 {strides = array<i32>} : memref<8x32xf32, #tpu.memory_space<vmem>>, vector<8x32xf32>,
    } else {
    }
    %c0_i32_6 = arith.constant 0 : i32
    %15 = arith.cmpi eq, %arg1, %c0_i32_6 : i32
    %16 = arith.extui %15 : i1 to i32
    %c0_i32_7 = arith.constant 0 : i32
    %17 = arith.cmpi ne, %16, %c0_i32_7 : i32
    scf.if %17 {
      %c0_8 = arith.constant 0 : index
      %c0_9 = arith.constant 0 : index
      %18 = vector.load %arg6[%c0_8, %c0_9] : memref<8x32xf32, #tpu.memory_space<vmem>>, vector<8x32xf32>
      %c0_10 = arith.constant 0 : index
      %c0_11 = arith.constant 0 : index
      %19 = vector.load %arg4[%c0_10, %c0_11] : memref<32x128xf32, #tpu.memory_space<vmem>>, vector<32x128xf32>
      %cst = arith.constant dense<0.000000e+00> : vector<8x128xf32>
      %20 = tpu.matmul %18, %19, %cst {dimension_numbers = #tpu.dot_dimension_numbers<[1], [0], [0], [1], [0, 0, 1, 1], [], []>} : vector<8x32xf32>, vector<32x128xf32>, vector<8x128xf32> -> vector<8x128xf32>
      %21 = vector.shape_cast %20 : vector<8x128xf32> to vector<1x8x128xf32>
      %c0_12 = arith.constant 0 : index
      %c0_13 = arith.constant 0 : index
      %c0_14 = arith.constant 0 : index
      %22 = vector.load %arg5[%c0_12, %c0_13, %c0_14] : memref<1x8x128xf32, #tpu.memory_space<vmem>>, vector<1x8x128xf32>
      tpu.vector_store %arg5[%c0_12, %c0_13, %c0_14], %21 {strides = array<i32>} : memref<1x8x128xf32, #tpu.memory_space<vmem>>, vector<1x8x128xf32>,
    } else {
    }
    return
  }
  func.func @transform_0(%arg0: i32, %arg1: i32) -> (i32, i32) {
    %c1_i32 = arith.constant 1 : i32
    %0 = arith.muli %arg0, %c1_i32 : i32
    %1 = arith.addi %0, %arg1 : i32
    %c0_i32 = arith.constant 0 : i32
    %c0_i32_0 = arith.constant 0 : i32
    return %c0_i32, %1 : i32, i32
  }
  func.func @transform_1(%arg0: i32, %arg1: i32) -> (i32, i32) {
    %c1_i32 = arith.constant 1 : i32
    %0 = arith.muli %arg0, %c1_i32 : i32
    %1 = arith.addi %0, %arg1 : i32
    %c0_i32 = arith.constant 0 : i32
    %2 = arith.minsi %1, %c0_i32 : i32
    %c0_i32_0 = arith.constant 0 : i32
    %c0_i32_1 = arith.constant 0 : i32
    return %2, %c0_i32_0 : i32, i32
  }
  func.func @transform_2(%arg0: i32, %arg1: i32) -> (i32, i32) {
    %c0_i32 = arith.constant 0 : i32
    %c0_i32_0 = arith.constant 0 : i32
    %c0_i32_1 = arith.constant 0 : i32
    return %c0_i32, %c0_i32_0 : i32, i32
  }
  func.func @transform_3(%arg0: i32, %arg1: i32) -> (i32, i32, i32) {
    %c0_i32 = arith.constant 0 : i32
    %c0_i32_0 = arith.constant 0 : i32
    %c0_i32_1 = arith.constant 0 : i32
    return %arg0, %c0_i32, %c0_i32_0 : i32, i32, i32
  }
}

</mosaic_0001>

<bundles_post_ra>
// kernel: tpu_custom_call.1
= control target key start
LH: loop header
LB: loop body
LE: loop exit
PB: predicated region body
PF: predicated region fallthrough
CT: control target
= control target key end

     0   :  { %8 = vsyncpa [#allocation4], 0  ;;  %s681_s0 = inlined_call_operand.hbm [shape: s32[1,128], index: 0, kind: input, shape index: {}]   ;;  %s682_s1 = inlined_call_operand.hbm [shape: f32[8,32], index: 1, kind: input, shape index: {}]   ;;  %s683_s2 = inlined_call_operand.hbm [shape: f32[32,128], index: 2, kind: input, shape index: {}]   ;;  %s684_s3 = inlined_call_operand.hbm [shape: f32[1,8,128], index: 3, kind: output, shape index: {}]  }
   0x1   :  { %9 = vsyncpa [#allocation7], 0 }
   0x2   :  { %10 = vsyncpa [#allocation5], 0  ;;  %s600_s12 = smov [#allocation3]   ;;  %s506_s16 = scalar_lea.hbm %s681_s0, 16 }
   0x3   :  { %s20_s13 = sshll.u32 %s600_s12, 4  ;;  %p507_p0 = scmp.ne.s32.totalorder %s681_s0, %s506_s16  ;;  %s21_s13 = int_to_ptr.vmem [resolvable:$true] %s20_s13 }
   0x4   :  { %p510_p1 = scmp.lt.u32.totalorder %s506_s16, %s681_s0 }
   0x6   :  { %p512_p2 = pnand %p510_p1, %p507_p0 }
   0x8   :  { %515 = shalt.err (!%p512_p2)
}
   0x9   :  { %s516_s21 = scalar_lea.vmem %s21_s13, 16  ;;  %s520_s22 = scalar_lea.vmem %s21_s13, 32 }
   0xa   :  { %p517_p3 = scmp.ne.s32.totalorder %s21_s13, %s516_s21  ;;  %p521_p4 = scmp.lt.s32.totalorder %s21_s13, %s21_s13 }
   0xb   :  { %p522_p5 = scmp.lt.s32.totalorder %s520_s22, %s516_s21 }
   0xd   :  { %p523_p6 = por %p522_p5, %p521_p4 }
   0xf   :  { %p524_p7 = pnand %p523_p6, %p517_p3 }
  0x11   :  { %527 = shalt.err (!%p524_p7)
}
  0x12   :  { %23 = dma.hbm_to_vmem [thread:$0]  %s681_s0, 16, %s21_s13, [#allocation4]  }
  0x13   :  { %34 = vsyncadd [#allocation7], 1920  ;;  %s601_s25 = smov [#allocation6]   ;;  %s528_s29 = scalar_lea.hbm %s682_s1, 128 }
  0x14   :  { %s39_s26 = sshll.u32 %s601_s25, 4  ;;  %p529_p8 = scmp.ne.s32.totalorder %s682_s1, %s528_s29  ;;  %s40_s26 = int_to_ptr.vmem [resolvable:$true] %s39_s26 }
  0x15   :  { %p532_p9 = scmp.lt.u32.totalorder %s528_s29, %s682_s1 }
  0x17   :  { %p534_p10 = pnand %p532_p9, %p529_p8 }
  0x19   :  { %537 = shalt.err (!%p534_p10)
}
  0x1a   :  { %s538_s7 = scalar_lea.vmem %s40_s26, 128  ;;  %s542_s0 = scalar_lea.vmem %s40_s26, 2048 }
  0x1b   :  { %p539_p11 = scmp.ne.s32.totalorder %s40_s26, %s538_s7  ;;  %p543_p12 = scmp.lt.s32.totalorder %s40_s26, %s40_s26 }
  0x1c   :  { %p544_p13 = scmp.lt.s32.totalorder %s542_s0, %s538_s7 }
  0x1e   :  { %p545_p0 = por %p544_p13, %p543_p12 }
  0x20   :  { %p546_p1 = pnand %p545_p0, %p539_p11 }
  0x22   :  { %549 = shalt.err (!%p546_p1)
}
  0x23   :  { %s602_s8 = smov 128   ;;  %s603_s9 = smov 8  }
  0x24   :  { %45 = dma.hbm_to_vmem [thread:$0]  %s682_s1, 128, %s40_s26, [#allocation7], %s602_s8, %s602_s8, %s603_s9  }
  0x25   :  { %s604_s12 = smov [#allocation8]   ;;  %s550_s16 = scalar_lea.hbm %s683_s2, 512 }
  0x26   :  { %s51_s13 = sshll.u32 %s604_s12, 4  ;;  %p551_p2 = scmp.ne.s32.totalorder %s683_s2, %s550_s16  ;;  %s52_s13 = int_to_ptr.vmem [resolvable:$true] %s51_s13 }
  0x27   :  { %p554_p3 = scmp.lt.u32.totalorder %s550_s16, %s683_s2 }
  0x29   :  { %p556_p4 = pnand %p554_p3, %p551_p2 }
  0x2b   :  { %559 = shalt.err (!%p556_p4)
}
  0x2c   :  { %s560_s21 = scalar_lea.vmem %s52_s13, 512  ;;  %p565_p6 = scmp.lt.s32.totalorder %s52_s13, %s52_s13 }
  0x2d   :  { %p561_p5 = scmp.ne.s32.totalorder %s52_s13, %s560_s21  ;;  %p566_p7 = scmp.lt.s32.totalorder %s560_s21, %s560_s21 }
  0x2f   :  { %p567_p8 = por %p566_p7, %p565_p6 }
  0x31   :  { %p568_p9 = pnand %p567_p8, %p561_p5 }
  0x33   :  { %571 = shalt.err (!%p568_p9)
}
  0x34   :  { %57 = dma.hbm_to_vmem [thread:$0]  %s683_s2, 512, %s52_s13, [#allocation7], %s602_s8, %s602_s8, %s603_s9  }
  0x35   :  { %594 = dma.done.wait [#allocation4], 16  }
  0x36   :  { %595 = vsyncadd [#allocation4], 4294967280 }
  0x37   :  { %596 = dma.done.wait [#allocation7], 2560  }
  0x38   :  { %597 = vsyncadd [#allocation7], 4294964736  ;;  %v82_v0 = vlaneseq  ;;  %v605_v1 = vmov 0.0   ;;  %vm606_vm0 = vmmov 0   ;;  %vm79_vm1 = vcmask 261120   ;;  %v220_v3 = vld [vmem:[#allocation6] sm:$0xff] }
  0x39   :  { %474 = vmatprep.subr.mxu0 %v605_v1  ;;  %476 = vmatprep.mubr.msk.f32.mxu0 %vm606_vm0, %v605_v1  ;;  %80 = vst.msk [vmem:[#allocation2] sm:$0xff] %vm79_vm1, %v605_v1  ;;  %v461_v4 = vld [vmem:[#allocation3] ss:$0 sm:$0xff]  ;;  %v607_v5 = vmov 1.0   ;;  %v364_v6 = vld [vmem:[#allocation8] sm:$0xff]  ;;  %v365_v7 = vld [vmem:[#allocation8 + $0x8] sm:$0xff] }
  0x3a   :  { %487 = vmatprep.mubr.msk.f32.mxu1 %vm606_vm0, %v605_v1  ;;  %v83_v2 = vshrl.u32 %v82_v0, 7  ;;  %475 = vmatpush3.msra.mxu0 %v220_v3  ;;  %v491_v8 = vpack.c.bf16 %v365_v7, %v364_v6  ;;  %v608_v9 = vmov 0.0|0.0   ;;  %v366_v10 = vld [vmem:[#allocation8 + $0x10] sm:$0xff]  ;;  %v367_v11 = vld [vmem:[#allocation8 + $0x18] sm:$0xff]  ;;  %s609_s2 = smov [#allocation9]  }
  0x3b   :  { %490 = vmatprep.subr.bf16.mxu1 %v608_v9  ;;  %v494_v12 = vpack.c.bf16 %v367_v11, %v366_v10  ;;  %s449_s23 = sshll.u32 %s609_s2, 4  ;;  %s450_s23 = int_to_ptr.vmem [resolvable:$true] %s449_s23 }
  0x3c   :  { %vm88_vm2 = vcmp.eq.s32.totalorder %v83_v2, %v461_v4  ;;  %492 = vmatpush3.bf16.msra.mxu1 %v491_v8  ;;  %s572_s24 = scalar_lea.vmem %s450_s23, 128  ;;  %p577_p11 = scmp.lt.s32.totalorder %s450_s23, %s450_s23 }
  0x3d   :  { %477 = vmatmul.mubr.msk.f32.vlgmr.msra.gmra.mrb[0].mxu0 %vm88_vm2, %v607_v5  ;;  %493 = vmatprep.subr.bf16.mxu1 %v608_v9  ;;  %p573_p10 = scmp.ne.s32.totalorder %s450_s23, %s572_s24  ;;  %p578_p12 = scmp.lt.s32.totalorder %s572_s24, %s572_s24 }
  0x3f   :  { %p579_p13 = por %p578_p12, %p577_p11 }
  0x40   :  { %495 = vmatpush3.bf16.msra.mxu1 %v494_v12  ;;  %v286_v13 = vld [vmem:[#allocation2] sm:$0xff] }
  0x41   :  { %p580_p0 = pnand %p579_p13, %p573_p10 }
 0x110   :  { %v353_v14 = vpop.f32.mrb[0].mxu0 }
 0x111   :  { %v357_v15 = vadd.f32 %v353_v14, %v286_v13  ;;  %v478_v16 = vpop.f32.mrb[1].mxu0 }
 0x113   :  { %359 = vst.msk [vmem:[#allocation2] sm:$0xff] %vm79_vm1, %v357_v15 }
 0x11a   :  { %v363_v17 = vld [vmem:[#allocation2] sm:$0xff] }
 0x11b   :  { %488 = vmatmul.mubr.msk.f32.vlgmr.msra.gmra.mrb[0].mxu1 %vm79_vm1, %v363_v17 }
 0x1ee   :  { %v438_v18 = vpop.f32.mrb[0].mxu1 }
 0x1ef   :  { %442 = vst [vmem:[#allocation9] sm:$0xff] %v438_v18  ;;  %v489_v19 = vpop.f32.mrb[1].mxu1 }
 0x1f0   :  { %583 = shalt.err (!%p580_p0)
}
 0x1f1   :  { %s584_s27 = scalar_lea.hbm %s684_s3, 128 }
 0x1f2   :  { %p585_p1 = scmp.ne.s32.totalorder %s684_s3, %s584_s27  ;;  %p588_p2 = scmp.lt.u32.totalorder %s584_s27, %s684_s3 }
 0x1f4   :  { %p590_p3 = pnand %p588_p2, %p585_p1 }
 0x1f6   :  { %593 = shalt.err (!%p590_p3)
}
 0x1f7   :  { %452 = dma.vmem_to_hbm [thread:$0]  %s450_s23, 128, %s684_s3, [#allocation5]  }
 0x1f8   :  { %598 = dma.done.wait [#allocation5], 128  }
 0x1f9   :  { %599 = vsyncadd [#allocation5], 4294967168 }
 0x1fa   :  { %456 = vsyncpa [#allocation4], 1 }
 0x1fb   :  { %457 = vsyncpa [#allocation7], 1 }
 0x1fc   :  { %458 = vsyncpa [#allocation5], 1 }

</bundles_post_ra>
